<compile_context>
chip_gen: v6e
topology: v6e:2x2x1
jax: 0.10.0
libtpu: 0.0.40
codegen_flags: <defaults>
</compile_context>

<pallas_src>
import functools

import jax
import jax.numpy as jnp
from jax.experimental import pallas as pl
from jax.experimental.pallas import tpu as pltpu

HIDDEN = 256


def _cdiv(a, b):
    return (a + b - 1) // b


def _round_up(x, m):
    return ((x + m - 1) // m) * m


def _actor_kernel(x_ref, w1_ref, b1_ref, w2_ref, b2_ref, w3_ref, b3_ref,
                  o_ref, *, max_action):
    # Layer 1: Linear(state_dim -> 256) + ReLU.  bf16 operands, f32 accumulate.
    x = x_ref[...].astype(jnp.bfloat16)
    h1 = jnp.dot(x, w1_ref[...], preferred_element_type=jnp.float32)
    h1 = jnp.maximum(h1 + b1_ref[...], 0.0)

    # Layer 2: Linear(256 -> 256) + ReLU.
    h2 = jnp.dot(h1.astype(jnp.bfloat16), w2_ref[...],
                 preferred_element_type=jnp.float32)
    h2 = jnp.maximum(h2 + b2_ref[...], 0.0)

    # Layer 3: Linear(256 -> action_dim) + Tanh, scaled by max_action.
    h3 = jnp.dot(h2.astype(jnp.bfloat16), w3_ref[...],
                 preferred_element_type=jnp.float32)
    o_ref[...] = (max_action * jnp.tanh(h3 + b3_ref[...])).astype(o_ref.dtype)


def prepare_actor_params(params):
    """One-time conversion (call at init / after each param update, NOT per
    forward): weights -> bf16, biases -> f32 with shape (1, out)."""
    return {
        "w1": params["w1"].astype(jnp.bfloat16),
        "w2": params["w2"].astype(jnp.bfloat16),
        "w3": params["w3"].astype(jnp.bfloat16),
        "b1": params["b1"].astype(jnp.float32).reshape(1, -1),
        "b2": params["b2"].astype(jnp.float32).reshape(1, -1),
        "b3": params["b3"].astype(jnp.float32).reshape(1, -1),
    }


def actor_forward(state, prepared, max_action, *, block_b=1024,
                  min_grid_steps=None):
    """state: (B, state_dim) f32.  prepared: output of prepare_actor_params."""
    B, state_dim = state.shape
    action_dim = prepared["w3"].shape[1]

    # Batch tiling: bound padding waste to <8 rows per tile, and give v7x's
    # second TensorCore work once the batch is big enough to split.
    if min_grid_steps is None:
        min_grid_steps = 2 if B >= 256 else 1
    steps = max(_cdiv(B, block_b), min_grid_steps)
    tb = _round_up(_cdiv(B, steps), 8)
    b_p = steps * tb

    x = state.astype(jnp.float32)
    if b_p != B:
        x = jnp.pad(x, ((0, b_p - B), (0, 0)))

    w1, w2, w3 = prepared["w1"], prepared["w2"], prepared["w3"]
    b1, b2, b3 = prepared["b1"], prepared["b2"], prepared["b3"]

    cost = pl.CostEstimate(
        flops=2 * b_p * (state_dim * HIDDEN + HIDDEN * HIDDEN
                         + HIDDEN * action_dim),
        transcendentals=b_p * action_dim,
        bytes_accessed=(b_p * state_dim * 4
                        + (w1.size + w2.size + w3.size) * 2
                        + (b1.size + b2.size + b3.size) * 4
                        + b_p * action_dim * 4),
    )

    kernel = functools.partial(_actor_kernel, max_action=float(max_action))
    out = pl.pallas_call(
        kernel,
        out_shape=jax.ShapeDtypeStruct((b_p, action_dim), jnp.float32),
        grid=(steps,),
        in_specs=[
            pl.BlockSpec((tb, state_dim), lambda i: (i, 0)),       # state (streamed, unpadded lanes)
            pl.BlockSpec((state_dim, HIDDEN), lambda i: (0, 0)),   # w1 (VMEM-resident)
            pl.BlockSpec((1, HIDDEN), lambda i: (0, 0)),           # b1
            pl.BlockSpec((HIDDEN, HIDDEN), lambda i: (0, 0)),      # w2
            pl.BlockSpec((1, HIDDEN), lambda i: (0, 0)),           # b2
            pl.BlockSpec((HIDDEN, action_dim), lambda i: (0, 0)),  # w3
            pl.BlockSpec((1, action_dim), lambda i: (0, 0)),       # b3
        ],
        out_specs=pl.BlockSpec((tb, action_dim), lambda i: (i, 0)),
        compiler_params=pltpu.CompilerParams(
            dimension_semantics=("parallel",)),
        cost_estimate=cost,
    )(x, w1, b1, w2, b2, w3, b3)

    return out[:B] if b_p != B else out


def init_actor_params(key, state_dim, action_dim):
    """PyTorch nn.Linear-style init: U(-1/sqrt(fan_in), 1/sqrt(fan_in)).
    Weights stored transposed relative to PyTorch, i.e. (in, out)."""
    ks = jax.random.split(key, 6)

    def linear(kw, kb, fan_in, fan_out):
        bound = 1.0 / jnp.sqrt(fan_in)
        w = jax.random.uniform(kw, (fan_in, fan_out), jnp.float32, -bound, bound)
        b = jax.random.uniform(kb, (1, fan_out), jnp.float32, -bound, bound)
        return w, b

    w1, b1 = linear(ks[0], ks[1], state_dim, HIDDEN)
    w2, b2 = linear(ks[2], ks[3], HIDDEN, HIDDEN)
    w3, b3 = linear(ks[4], ks[5], HIDDEN, action_dim)
    return {"w1": w1, "b1": b1, "w2": w2, "b2": b2, "w3": w3, "b3": b3}


def actor_reference_mixed(state, params, max_action):
    """Matches kernel precision: bf16 matmul operands, f32 accumulate/epilogue."""
    bf = lambda a: a.astype(jnp.bfloat16)
    h = jnp.dot(bf(state), bf(params["w1"]), preferred_element_type=jnp.float32)
    h = jnp.maximum(h + params["b1"], 0.0)
    h = jnp.dot(bf(h), bf(params["w2"]), preferred_element_type=jnp.float32)
    h = jnp.maximum(h + params["b2"], 0.0)
    z = jnp.dot(bf(h), bf(params["w3"]), preferred_element_type=jnp.float32)
    return max_action * jnp.tanh(z + params["b3"])


def actor_reference_f32(state, params, max_action):
    h = jnp.maximum(state @ params["w1"] + params["b1"], 0.0)
    h = jnp.maximum(h @ params["w2"] + params["b2"], 0.0)
    return max_action * jnp.tanh(h @ params["w3"] + params["b3"])


if __name__ == "__main__":
    key = jax.random.PRNGKey(0)
    k_params, k_state = jax.random.split(key)

    batch, state_dim, action_dim = 8, 16, 8
    max_action = 2.0

    params = init_actor_params(k_params, state_dim, action_dim)
    prepared = prepare_actor_params(params)   # one-time, outside the hot path
    state = jax.random.normal(k_state, (batch, state_dim), jnp.float32)

    out = actor_forward(state, prepared, max_action)
    out = jax.block_until_ready(out)
    assert out.shape == (batch, action_dim)

    # Strict check vs a reference with the same mixed precision as the kernel.
    ref_mixed = actor_reference_mixed(state, params, max_action)
    assert jnp.allclose(out, ref_mixed, atol=1e-3, rtol=1e-3), \
        "mismatch vs mixed-precision reference"

    # Loose check vs the full-f32 PyTorch-equivalent reference (bf16 operand error).
    ref_f32 = actor_reference_f32(state, params, max_action)
    assert jnp.allclose(out, ref_f32, atol=5e-2, rtol=5e-2), \
        "mismatch vs f32 reference"

    print("KERNEL_OK")
</pallas_src>

<mosaic_0001>
module attributes {stable_mosaic.version = 11 : i64} {
  func.func @_actor_kernel(%arg0: i32, %arg1: memref<8x16xf32, #tpu.memory_space<vmem>>, %arg2: memref<16x256xbf16, #tpu.memory_space<vmem>>, %arg3: memref<1x256xf32, #tpu.memory_space<vmem>>, %arg4: memref<256x256xbf16, #tpu.memory_space<vmem>>, %arg5: memref<1x256xf32, #tpu.memory_space<vmem>>, %arg6: memref<256x8xbf16, #tpu.memory_space<vmem>>, %arg7: memref<1x8xf32, #tpu.memory_space<vmem>>, %arg8: memref<8x8xf32, #tpu.memory_space<vmem>>) attributes {dimension_semantics = [#tpu.dimension_semantics<parallel>], iteration_bounds = array<i64: 1>, scalar_prefetch = 0 : i64, scratch_operands = 0 : i64, tpu.core_type = #tpu.core_type<tc>, window_params = [{transform_indices = @transform_0, window_bounds = array<i64: 8, 16>}, {pipeline_mode = #tpu.pipeline_mode<synchronous>, transform_indices = @transform_1, window_bounds = array<i64: 16, 256>}, {pipeline_mode = #tpu.pipeline_mode<synchronous>, transform_indices = @transform_2, window_bounds = array<i64: 1, 256>}, {pipeline_mode = #tpu.pipeline_mode<synchronous>, transform_indices = @transform_3, window_bounds = array<i64: 256, 256>}, {pipeline_mode = #tpu.pipeline_mode<synchronous>, transform_indices = @transform_4, window_bounds = array<i64: 1, 256>}, {pipeline_mode = #tpu.pipeline_mode<synchronous>, transform_indices = @transform_5, window_bounds = array<i64: 256, 8>}, {pipeline_mode = #tpu.pipeline_mode<synchronous>, transform_indices = @transform_6, window_bounds = array<i64: 1, 8>}, {transform_indices = @transform_7, window_bounds = array<i64: 8, 8>}]} {
    %c0 = arith.constant 0 : index
    %c0_0 = arith.constant 0 : index
    %0 = vector.load %arg1[%c0, %c0_0] : memref<8x16xf32, #tpu.memory_space<vmem>>, vector<8x16xf32>
    %1 = arith.truncf %0 : vector<8x16xf32> to vector<8x16xbf16>
    %c0_1 = arith.constant 0 : index
    %c0_2 = arith.constant 0 : index
    %2 = vector.load %arg2[%c0_1, %c0_2] : memref<16x256xbf16, #tpu.memory_space<vmem>>, vector<16x256xbf16>
    %cst = arith.constant dense<0.000000e+00> : vector<8x256xf32>
    %3 = tpu.matmul %1, %2, %cst {dimension_numbers = #tpu.dot_dimension_numbers<[1], [0], [0], [1], [0, 0, 1, 1], [], []>} : vector<8x16xbf16>, vector<16x256xbf16>, vector<8x256xf32> -> vector<8x256xf32>
    %c0_3 = arith.constant 0 : index
    %c0_4 = arith.constant 0 : index
    %4 = vector.load %arg3[%c0_3, %c0_4] : memref<1x256xf32, #tpu.memory_space<vmem>>, vector<1x256xf32>
    %5 = vector.broadcast %4 : vector<1x256xf32> to vector<8x256xf32>
    %6 = arith.addf %3, %5 : vector<8x256xf32>
    %cst_5 = arith.constant 0.000000e+00 : f32
    %7 = vector.broadcast %cst_5 : f32 to vector<8x256xf32>
    %8 = arith.maximumf %6, %7 : vector<8x256xf32>
    %9 = arith.truncf %8 : vector<8x256xf32> to vector<8x256xbf16>
    %c0_6 = arith.constant 0 : index
    %c0_7 = arith.constant 0 : index
    %10 = vector.load %arg4[%c0_6, %c0_7] : memref<256x256xbf16, #tpu.memory_space<vmem>>, vector<256x256xbf16>
    %cst_8 = arith.constant dense<0.000000e+00> : vector<8x256xf32>
    %11 = tpu.matmul %9, %10, %cst_8 {dimension_numbers = #tpu.dot_dimension_numbers<[1], [0], [0], [1], [0, 0, 1, 1], [], []>} : vector<8x256xbf16>, vector<256x256xbf16>, vector<8x256xf32> -> vector<8x256xf32>
    %c0_9 = arith.constant 0 : index
    %c0_10 = arith.constant 0 : index
    %12 = vector.load %arg5[%c0_9, %c0_10] : memref<1x256xf32, #tpu.memory_space<vmem>>, vector<1x256xf32>
    %13 = vector.broadcast %12 : vector<1x256xf32> to vector<8x256xf32>
    %14 = arith.addf %11, %13 : vector<8x256xf32>
    %cst_11 = arith.constant 0.000000e+00 : f32
    %15 = vector.broadcast %cst_11 : f32 to vector<8x256xf32>
    %16 = arith.maximumf %14, %15 : vector<8x256xf32>
    %17 = arith.truncf %16 : vector<8x256xf32> to vector<8x256xbf16>
    %c0_12 = arith.constant 0 : index
    %c0_13 = arith.constant 0 : index
    %18 = vector.load %arg6[%c0_12, %c0_13] : memref<256x8xbf16, #tpu.memory_space<vmem>>, vector<256x8xbf16>
    %cst_14 = arith.constant dense<0.000000e+00> : vector<8x8xf32>
    %19 = tpu.matmul %17, %18, %cst_14 {dimension_numbers = #tpu.dot_dimension_numbers<[1], [0], [0], [1], [0, 0, 1, 1], [], []>} : vector<8x256xbf16>, vector<256x8xbf16>, vector<8x8xf32> -> vector<8x8xf32>
    %c0_15 = arith.constant 0 : index
    %c0_16 = arith.constant 0 : index
    %20 = vector.load %arg7[%c0_15, %c0_16] : memref<1x8xf32, #tpu.memory_space<vmem>>, vector<1x8xf32>
    %21 = vector.broadcast %20 : vector<1x8xf32> to vector<8x8xf32>
    %22 = arith.addf %19, %21 : vector<8x8xf32>
    %23 = math.tanh %22 : vector<8x8xf32>
    %cst_17 = arith.constant 2.000000e+00 : f32
    %24 = vector.broadcast %cst_17 : f32 to vector<8x8xf32>
    %25 = arith.mulf %24, %23 : vector<8x8xf32>
    %c0_18 = arith.constant 0 : index
    %c0_19 = arith.constant 0 : index
    %26 = vector.load %arg8[%c0_18, %c0_19] : memref<8x8xf32, #tpu.memory_space<vmem>>, vector<8x8xf32>
    tpu.vector_store %arg8[%c0_18, %c0_19], %25 {strides = array<i32>} : memref<8x8xf32, #tpu.memory_space<vmem>>, vector<8x8xf32>,
    return
  }
  func.func @transform_0(%arg0: i32) -> (i32, i32) {
    %c0_i32 = arith.constant 0 : i32
    %c0_i32_0 = arith.constant 0 : i32
    return %arg0, %c0_i32 : i32, i32
  }
  func.func @transform_1(%arg0: i32) -> (i32, i32) {
    %c0_i32 = arith.constant 0 : i32
    %c0_i32_0 = arith.constant 0 : i32
    %c0_i32_1 = arith.constant 0 : i32
    return %c0_i32, %c0_i32_0 : i32, i32
  }
  func.func @transform_2(%arg0: i32) -> (i32, i32) {
    %c0_i32 = arith.constant 0 : i32
    %c0_i32_0 = arith.constant 0 : i32
    %c0_i32_1 = arith.constant 0 : i32
    return %c0_i32, %c0_i32_0 : i32, i32
  }
  func.func @transform_3(%arg0: i32) -> (i32, i32) {
    %c0_i32 = arith.constant 0 : i32
    %c0_i32_0 = arith.constant 0 : i32
    %c0_i32_1 = arith.constant 0 : i32
    return %c0_i32, %c0_i32_0 : i32, i32
  }
  func.func @transform_4(%arg0: i32) -> (i32, i32) {
    %c0_i32 = arith.constant 0 : i32
    %c0_i32_0 = arith.constant 0 : i32
    %c0_i32_1 = arith.constant 0 : i32
    return %c0_i32, %c0_i32_0 : i32, i32
  }
  func.func @transform_5(%arg0: i32) -> (i32, i32) {
    %c0_i32 = arith.constant 0 : i32
    %c0_i32_0 = arith.constant 0 : i32
    %c0_i32_1 = arith.constant 0 : i32
    return %c0_i32, %c0_i32_0 : i32, i32
  }
  func.func @transform_6(%arg0: i32) -> (i32, i32) {
    %c0_i32 = arith.constant 0 : i32
    %c0_i32_0 = arith.constant 0 : i32
    %c0_i32_1 = arith.constant 0 : i32
    return %c0_i32, %c0_i32_0 : i32, i32
  }
  func.func @transform_7(%arg0: i32) -> (i32, i32) {
    %c0_i32 = arith.constant 0 : i32
    %c0_i32_0 = arith.constant 0 : i32
    return %arg0, %c0_i32 : i32, i32
  }
}

</mosaic_0001>

<bundles_post_ra>
// kernel: tpu_custom_call.1
= control target key start
LH: loop header
LB: loop body
LE: loop exit
PB: predicated region body
PF: predicated region fallthrough
CT: control target
= control target key end

     0   :  { %12 = vsyncpa [#allocation3], 0  ;;  %s869_s0 = inlined_call_operand.vmem [shape: f32[8,16], index: 0, kind: input, shape index: {}]   ;;  %s870_s1 = inlined_call_operand.vmem [shape: bf16[16,256], index: 1, kind: input, shape index: {}]   ;;  %s871_s2 = inlined_call_operand.vmem [shape: f32[1,256], index: 2, kind: input, shape index: {}]   ;;  %s872_s3 = inlined_call_operand.hbm [shape: bf16[256,256], index: 3, kind: input, shape index: {}]   ;;  %s873_s4 = inlined_call_operand.vmem [shape: f32[1,256], index: 4, kind: input, shape index: {}]   ;;  %s874_s5 = inlined_call_operand.vmem [shape: bf16[256,8], index: 5, kind: input, shape index: {}]   ;;  %s875_s6 = inlined_call_operand.vmem [shape: f32[1,8], index: 6, kind: input, shape index: {}]   ;;  %s876_s7 = inlined_call_operand.hbm [shape: f32[8,8], index: 7, kind: output, shape index: {}]  }
   0x1   :  { %13 = vsyncpa [#allocation4], 0  ;;  %s752_s24 = smov [#allocation2]  }
   0x2   :  { %s25_s25 = sshll.u32 %s752_s24, 4  ;;  %s26_s25 = int_to_ptr.vmem [resolvable:$true] %s25_s25 }
   0x3   :  { %s716_s26 = scalar_lea.vmem %s26_s25, 4096  ;;  %p721_p1 = scmp.lt.s32.totalorder %s26_s25, %s26_s25 }
   0x4   :  { %p717_p0 = scmp.ne.s32.totalorder %s26_s25, %s716_s26  ;;  %p722_p2 = scmp.lt.s32.totalorder %s716_s26, %s716_s26 }
   0x6   :  { %p723_p3 = por %p722_p2, %p721_p1 }
   0x8   :  { %p724_p4 = pnand %p723_p3, %p717_p0 }
   0xa   :  { %727 = shalt.err (!%p724_p4)
}
   0xb   :  { %s753_s27 = smov 128   ;;  %s754_s28 = smov 8  }
   0xc   :  { %31 = dma.hbm_to_vmem [thread:$0]  %s872_s3, 4096, %s26_s25, [#allocation3], %s753_s27, %s753_s27, %s754_s28  }
   0xd   :  { %748 = dma.done.wait [#allocation3], 4096  }
   0xe   :  { %749 = vsyncadd [#allocation3], 4294963200  ;;  %v755_v0 = vmov 0   ;;  %v639_v1 = vld [vmem:[%s870_s1 + $0x4] ss:$8 sps:$4 sm:$0xff]   ;;  %vm68_vm0 = vcmask 130048   ;;  %v48_v49 = vlaneseq }
   0xf   :  { %104 = vmatprep.mubr.bf16.mxu0 %v755_v0  ;;  %v641_v2 = vld [vmem:[%s870_s1] ss:$8 sps:$4 sm:$0xff]   ;;  %86 = vmatprep.subr.bf16.mxu0 %v639_v1  ;;  %v642_v5 = vld [vmem:[#allocation2 + $0x74] ss:$8 sps:$4 sm:$0xff]   ;;  %v644_v6 = vld [vmem:[#allocation2 + $0x70] ss:$8 sps:$4 sm:$0xff]  }
  0x10   :  { %v42_v3 = vld [vmem:[%s869_s0] sm:$0xff]  ;;  %87 = vmatpush1.bf16.msra.mxu0 %v641_v2  ;;  %321 = vmatprep.subr.bf16.mxu1 %v642_v5  ;;  %v648_v9 = vld [vmem:[#allocation2 + $0x54] ss:$8 sps:$4 sm:$0xff]   ;;  %v650_v10 = vld [vmem:[#allocation2 + $0x50] ss:$8 sps:$4 sm:$0xff]   ;;  %v49_v50 = vshrl.u32 %v48_v49, 7 }
  0x11   :  { %v43_v4 = vpack.c.bf16 %v42_v3, %v42_v3  ;;  %v645_v7 = vld [vmem:[#allocation2 + $0x64] ss:$8 sps:$4 sm:$0xff]   ;;  %322 = vmatpush1.bf16.msra.mxu1 %v644_v6  ;;  %v647_v8 = vld [vmem:[#allocation2 + $0x60] ss:$8 sps:$4 sm:$0xff]   ;;  %v654_v13 = vld [vmem:[#allocation2 + $0x34] ss:$8 sps:$4 sm:$0xff]  }
  0x12   :  { %323 = vmatprep.subr.bf16.mxu1 %v645_v7  ;;  %v651_v11 = vld [vmem:[#allocation2 + $0x44] ss:$8 sps:$4 sm:$0xff]   ;;  %v653_v12 = vld [vmem:[#allocation2 + $0x40] ss:$8 sps:$4 sm:$0xff]   ;;  %v656_v14 = vld [vmem:[#allocation2 + $0x30] ss:$8 sps:$4 sm:$0xff]  }
  0x13   :  { %562 = vmatmul.mubr.msk.bf16.vlgmr.msra.gmra.mxu0 %vm68_vm0, %v43_v4  ;;  %v657_v15 = vld [vmem:[#allocation2 + $0x24] ss:$8 sps:$4 sm:$0xff]   ;;  %v659_v16 = vld [vmem:[#allocation2 + $0x20] ss:$8 sps:$4 sm:$0xff]   ;;  %v660_v17 = vld [vmem:[#allocation2 + $0x14] ss:$8 sps:$4 sm:$0xff]  }
  0x14   :  { %v662_v18 = vld [vmem:[#allocation2 + $0x10] ss:$8 sps:$4 sm:$0xff]   ;;  %v663_v19 = vld [vmem:[#allocation2 + $0x4] ss:$8 sps:$4 sm:$0xff]   ;;  %v665_v20 = vld [vmem:[#allocation2] ss:$8 sps:$4 sm:$0xff]  }
  0x15   :  { %324 = vmatpush1.bf16.msra.mxu1 %v647_v8  ;;  %v666_v21 = vld [vmem:[#allocation2 + $0xf4] ss:$8 sps:$4 sm:$0xff]   ;;  %v668_v22 = vld [vmem:[#allocation2 + $0xf0] ss:$8 sps:$4 sm:$0xff]   ;;  %v669_v23 = vld [vmem:[#allocation2 + $0xe4] ss:$8 sps:$4 sm:$0xff]  }
  0x16   :  { %325 = vmatprep.subr.bf16.mxu1 %v648_v9  ;;  %v671_v24 = vld [vmem:[#allocation2 + $0xe0] ss:$8 sps:$4 sm:$0xff]   ;;  %v672_v25 = vld [vmem:[#allocation2 + $0xd4] ss:$8 sps:$4 sm:$0xff]   ;;  %v674_v26 = vld [vmem:[#allocation2 + $0xd0] ss:$8 sps:$4 sm:$0xff]  }
  0x17   :  { %v675_v27 = vld [vmem:[#allocation2 + $0xc4] ss:$8 sps:$4 sm:$0xff]   ;;  %v677_v28 = vld [vmem:[#allocation2 + $0xc0] ss:$8 sps:$4 sm:$0xff]   ;;  %v678_v29 = vld [vmem:[#allocation2 + $0xb4] ss:$8 sps:$4 sm:$0xff]  }
  0x18   :  { %v680_v30 = vld [vmem:[#allocation2 + $0xb0] ss:$8 sps:$4 sm:$0xff]   ;;  %v681_v31 = vld [vmem:[#allocation2 + $0xa4] ss:$8 sps:$4 sm:$0xff]   ;;  %v683_v32 = vld [vmem:[#allocation2 + $0xa0] ss:$8 sps:$4 sm:$0xff]  }
  0x19   :  { %326 = vmatpush1.bf16.msra.mxu1 %v650_v10  ;;  %v684_v33 = vld [vmem:[#allocation2 + $0x94] ss:$8 sps:$4 sm:$0xff]   ;;  %v686_v34 = vld [vmem:[#allocation2 + $0x90] ss:$8 sps:$4 sm:$0xff]   ;;  %v687_v35 = vld [vmem:[#allocation2 + $0x84] ss:$8 sps:$4 sm:$0xff]  }
  0x1a   :  { %327 = vmatprep.subr.bf16.mxu1 %v651_v11  ;;  %v689_v36 = vld [vmem:[#allocation2 + $0x80] ss:$8 sps:$4 sm:$0xff]   ;;  %v690_v37 = vld [vmem:[%s874_s5 + $0x78] sm:$0xff]   ;;  %v692_v39 = vld [vmem:[%s874_s5 + $0x70] sm:$0xff]   ;;  %v50_v51 = vsub.s32 0, %v49_v50  ;;  %v54_v53 = vsub.s32 1, %v49_v50 }
  0x1b   :  { %v691_v38 = vld [vmem:[%s874_s5 + $0x38] sm:$0xff]   ;;  %612 = vmatprep.subr.bf16.mxu0 %v690_v37  ;;  %v693_v40 = vld [vmem:[%s874_s5 + $0x30] sm:$0xff]   ;;  %v694_v41 = vld [vmem:[%s874_s5 + $0x68] sm:$0xff]   ;;  %vm543_vm1 = vcmask 64512  }
  0x1c   :  { %613 = vmatpush3.bf16.msra.mxu0 %v691_v38  ;;  %v695_v42 = vld [vmem:[%s874_s5 + $0x28] sm:$0xff]   ;;  %v696_v43 = vld [vmem:[%s874_s5 + $0x60] sm:$0xff]   ;;  %v698_v45 = vld [vmem:[%s874_s5 + $0x58] sm:$0xff]  }
  0x1d   :  { %328 = vmatpush1.bf16.msra.mxu1 %v653_v12  ;;  %614 = vmatprep.subr.bf16.mxu0 %v692_v39  ;;  %v697_v44 = vld [vmem:[%s874_s5 + $0x20] sm:$0xff]   ;;  %v699_v46 = vld [vmem:[%s874_s5 + $0x18] sm:$0xff]   ;;  %v700_v47 = vld [vmem:[%s874_s5 + $0x50] sm:$0xff]  }
  0x1e   :  { %329 = vmatprep.subr.bf16.mxu1 %v654_v13  ;;  %v701_v48 = vld [vmem:[%s874_s5 + $0x10] sm:$0xff]   ;;  %v46_v52 = vld [vmem:[%s871_s2] sm:$0x3]  ;;  %v702_v2 = vld [vmem:[%s874_s5 + $0x48] sm:$0xff]  }
  0x1f   :  { %v51_v54 = vrot.slane %v46_v52, %v50_v51  ;;  %v55_v55 = vrot.slane %v46_v52, %v54_v53  ;;  %v703_v3 = vld [vmem:[%s874_s5 + $0x8] sm:$0xff]   ;;  %v704_v4 = vld [vmem:[%s874_s5 + $0x40] sm:$0xff]  }
  0x20   :  { %615 = vmatpush3.bf16.msra.mxu0 %v693_v40  ;;  %v705_v5 = vld [vmem:[%s874_s5] sm:$0xff]  }
  0x21   :  { %330 = vmatpush1.bf16.msra.mxu1 %v656_v14  ;;  %616 = vmatprep.subr.bf16.mxu0 %v694_v41  ;;  %v149_v6 = vld [vmem:[%s873_s4] sm:$0x3]  ;;  %s756_s4 = smov [#allocation5]  }
  0x22   :  { %331 = vmatprep.subr.bf16.mxu1 %v657_v15  ;;  %v154_v7 = vrot.slane %v149_v6, %v50_v51  ;;  %v158_v8 = vrot.slane %v149_v6, %v54_v53  ;;  %s551_s21 = sshll.u32 %s756_s4, 4  ;;  %s552_s21 = int_to_ptr.vmem [resolvable:$true] %s551_s21 }
  0x23   :  { %s728_s22 = scalar_lea.vmem %s552_s21, 128  ;;  %p733_p6 = scmp.lt.s32.totalorder %s552_s21, %s552_s21 }
  0x24   :  { %617 = vmatpush3.bf16.msra.mxu0 %v695_v42  ;;  %p729_p5 = scmp.ne.s32.totalorder %s552_s21, %s728_s22  ;;  %p734_p7 = scmp.lt.s32.totalorder %s728_s22, %s728_s22 }
  0x25   :  { %332 = vmatpush1.bf16.msra.mxu1 %v659_v16  ;;  %618 = vmatprep.subr.bf16.mxu0 %v696_v43 }
  0x26   :  { %333 = vmatprep.subr.bf16.mxu1 %v660_v17  ;;  %p735_p8 = por %p734_p7, %p733_p6 }
  0x28   :  { %619 = vmatpush3.bf16.msra.mxu0 %v697_v44  ;;  %p736_p9 = pnand %p735_p8, %p729_p5 }
  0x29   :  { %334 = vmatpush1.bf16.msra.mxu1 %v662_v18  ;;  %620 = vmatprep.subr.bf16.mxu0 %v698_v45 }
  0x2a   :  { %335 = vmatprep.subr.bf16.mxu1 %v663_v19 }
  0x2c   :  { %621 = vmatpush3.bf16.msra.mxu0 %v699_v46 }
  0x2d   :  { %336 = vmatpush1.bf16.msra.mxu1 %v665_v20  ;;  %622 = vmatprep.subr.bf16.mxu0 %v700_v47  ;;  %v595_v20 = vld [vmem:[%s875_s6] ss:$0 sm:$0xff] }
  0x2e   :  { %337 = vmatprep.subr.bf16.mxu1 %v666_v21 }
  0x30   :  { %623 = vmatpush3.bf16.msra.mxu0 %v701_v48 }
  0x31   :  { %338 = vmatpush2.bf16.msra.mxu1 %v668_v22  ;;  %624 = vmatprep.subr.bf16.mxu0 %v702_v2 }
  0x32   :  { %339 = vmatprep.subr.bf16.mxu1 %v669_v23 }
  0x34   :  { %625 = vmatpush3.bf16.msra.mxu0 %v703_v3 }
  0x35   :  { %340 = vmatpush2.bf16.msra.mxu1 %v671_v24  ;;  %626 = vmatprep.subr.bf16.mxu0 %v704_v4 }
  0x36   :  { %341 = vmatprep.subr.bf16.mxu1 %v672_v25 }
  0x38   :  { %627 = vmatpush3.bf16.msra.mxu0 %v705_v5 }
  0x39   :  { %342 = vmatpush2.bf16.msra.mxu1 %v674_v26 }
  0x3a   :  { %343 = vmatprep.subr.bf16.mxu1 %v675_v27 }
  0x3d   :  { %344 = vmatpush2.bf16.msra.mxu1 %v677_v28 }
  0x3e   :  { %345 = vmatprep.subr.bf16.mxu1 %v678_v29 }
  0x41   :  { %346 = vmatpush2.bf16.msra.mxu1 %v680_v30 }
  0x42   :  { %347 = vmatprep.subr.bf16.mxu1 %v681_v31 }
  0x45   :  { %348 = vmatpush2.bf16.msra.mxu1 %v683_v32 }
  0x46   :  { %349 = vmatprep.subr.bf16.mxu1 %v684_v33 }
  0x49   :  { %350 = vmatpush2.bf16.msra.mxu1 %v686_v34 }
  0x4a   :  { %351 = vmatprep.subr.bf16.mxu1 %v687_v35 }
  0x4d   :  { %352 = vmatpush2.bf16.msra.mxu1 %v689_v36 }
  0xd3   :  { %v106_v56 = vpop.f32.mrf.mxu0 }
  0xd4   :  { %v107_v57 = vadd.f32 %v106_v56, %v51_v54 }
  0xd5   :  { %v108_v58 = vpop.f32.mrf.mxu0 }
  0xd6   :  { %v109_v59 = vadd.f32 %v108_v58, %v55_v55  ;;  %v113_v60 = vmax.f32 %v107_v57, 0.0 }
  0xd7   :  { %v110_v61 = vpop.f32.mrf.mxu0 }
  0xd8   :  { %v114_v62 = vmax.f32 %v109_v59, 0.0  ;;  %v115_v1 = vpack.c.bf16 %v113_v60, %v113_v60 }
  0xd9   :  { %v111_v63 = vpop.f32.mrf.mxu0 }
  0xda   :  { %v116_v0 = vpack.c.bf16 %v114_v62, %v114_v62 }
  0xdc   :  { %353 = vmatprep.mubr.bf16.mxu1 %v116_v0 }
  0xdd   :  { %354 = vmatmul.mubr.bf16.vlgmr.msra.gmra.mxu1 %v115_v1 }
 0x19d   :  { %v355_v9 = vpop.f32.mrf.mxu1 }
 0x19e   :  { %v356_v10 = vadd.f32 %v355_v9, %v154_v7 }
 0x19f   :  { %v357_v11 = vpop.f32.mrf.mxu1 }
 0x1a0   :  { %v358_v12 = vadd.f32 %v357_v11, %v158_v8  ;;  %v362_v13 = vmax.f32 %v356_v10, 0.0 }
 0x1a1   :  { %v359_v14 = vpop.f32.mrf.mxu1 }
 0x1a2   :  { %v363_v15 = vmax.f32 %v358_v12, 0.0  ;;  %v364_v18 = vpack.c.bf16 %v362_v13, %v362_v13 }
 0x1a3   :  { %v360_v16 = vpop.f32.mrf.mxu1 }
 0x1a4   :  { %v365_v17 = vpack.c.bf16 %v363_v15, %v363_v15 }
 0x1a6   :  { %533 = vmatprep.mubr.bf16.mxu0 %v365_v17 }
 0x1a7   :  { %534 = vmatmul.mubr.bf16.vlgmr.msra.gmra.mxu0 %v364_v18 }
 0x267   :  { %v628_v19 = vpop.f32.mrf.mxu0 }
 0x269   :  { %v629_v21 = vpop.f32.mrf.mxu0 }
 0x26a   :  { %v630_v22 = vadd.f32 %v629_v21, %v628_v19 }
 0x26b   :  { %v631_v23 = vpop.f32.mrf.mxu0 }
 0x26c   :  { %v536_v24 = vadd.f32 %v630_v22, %v595_v20 }
 0x26d   :  { %v632_v25 = vpop.f32.mrf.mxu0 }
 0x26e   :  { %706 = vtanh.f32 %v536_v24 }
 0x27b   :  { %v707_v26 = vpop.eup %706 }
 0x27c   :  { %v542_v27 = vmul.f32 2.0, %v707_v26 }
 0x27e   :  { %544 = vst.msk [vmem:[#allocation5] sm:$0xff] %vm543_vm1, %v542_v27 }
 0x27f   :  { %739 = shalt.err (!%p736_p9)
}
 0x280   :  { %554 = dma.vmem_to_hbm [thread:$0]  %s552_s21, 128, %s876_s7, [#allocation4]  }
 0x281   :  { %750 = dma.done.wait [#allocation4], 128  }
 0x282   :  { %751 = vsyncadd [#allocation4], 4294967168 }
 0x283   :  { %558 = vsyncpa [#allocation3], 1 }
 0x284   :  { %559 = vsyncpa [#allocation4], 1 }

</bundles_post_ra>
